<compile_context>
chip_gen: v6e
topology: v6e:2x2x1
jax: 0.10.0
libtpu: 0.0.40
codegen_flags: <defaults>
</compile_context>

<pallas_src>
import functools

import jax
import jax.numpy as jnp
from jax.experimental import pallas as pl
from jax.experimental.pallas import tpu as pltpu

EPS = 1e-5  # nn.InstanceNorm2d default


def adain_kernel(gb_ref, x_ref, o_ref, *, gb_resident):
    """One grid step normalizes TM independent (sample, channel) rows.

    gb_ref : (rows, 2) VMEM-resident [1+gamma, beta] table (gb_resident=True)
             or (TM, 2) per-step block                      (gb_resident=False)
    x_ref  : (TM, HW)  features, one row per (n, c) pair
    o_ref  : (TM, HW)  output
    """
    tm, hw = x_ref.shape

    if gb_resident:
        row0 = pl.multiple_of(pl.program_id(0) * tm, tm)
        gb = gb_ref[pl.ds(row0, tm), :].astype(jnp.float32)   # (TM, 2)
    else:
        gb = gb_ref[...].astype(jnp.float32)                  # (TM, 2)
    g1 = gb[:, 0:1]                                           # 1 + gamma
    beta = gb[:, 1:2]

    x = x_ref[...].astype(jnp.float32)                        # (TM, HW)
    inv_hw = 1.0 / hw

    # two-pass stats on the VMEM-resident block (no extra HBM traffic)
    mean = jnp.sum(x, axis=-1, keepdims=True) * inv_hw        # (TM, 1)
    d = x - mean                                              # reused below
    var = jnp.sum(d * d, axis=-1, keepdims=True) * inv_hw     # biased variance

    # fold (1+gamma) and inv_std into a single per-row scale -> one FMA/element
    a = g1 * jax.lax.rsqrt(var + EPS)                         # (TM, 1)
    o_ref[...] = (d * a + beta).astype(o_ref.dtype)


def _vmem_capacity_bytes():
    """Per-core VMEM capacity, with safe fallbacks."""
    try:
        return int(pltpu.get_tpu_info().vmem_capacity_bytes)
    except Exception:
        pass
    try:
        kind = jax.devices()[0].device_kind.lower()
        if "v7" in kind:
            return 64 * 1024 * 1024
    except Exception:
        pass
    return 128 * 1024 * 1024


def _pick_tm(rows, hw, vmem_limit):
    """Row tile: multiple of 8, double-buffered f32 in+out blocks fit the budget."""
    if rows <= 8:
        return rows                                   # one full-dim block
    budget = int(vmem_limit * 0.7)                    # headroom for scratch + gb table
    per_row = 16 * hw                                 # f32 in + out, each double-buffered
    tm = max(8, min(4096, (budget // per_row) // 8 * 8))
    if rows >= 16:                                    # guarantee >= 2 grid steps (v7x dual-TC)
        half = (((rows + 1) // 2) + 7) // 8 * 8
        tm = min(tm, half)
    tm = min(tm, (rows // 8) * 8)                     # never wider than the problem
    return max(8, tm)


def adain_pallas(x, s, w_sn, b, tm=None):
    """x: (N, C, H, W), s: (N, S), w_sn: (2C, S) spectrally normalized, b: (2C,)."""
    N, C, H, W = x.shape
    HW = H * W
    NC = N * C

    # ---- style FC hoisted out of the kernel (tiny matmul; pure XLA) --------
    h = (s @ w_sn.T + b).astype(jnp.float32)          # (N, 2C)
    g1 = 1.0 + h[:, :C].reshape(NC, 1)                # (1 + gamma) row-aligned with x
    beta = h[:, C:].reshape(NC, 1)
    gb = jnp.concatenate([g1, beta], axis=1)          # (NC, 2)

    x_flat = x.reshape(NC, HW)                        # HW on the lane axis

    # ---- generation-aware sizing -------------------------------------------
    vmem_cap = _vmem_capacity_bytes()
    vmem_limit = max(32 << 20, min(int(vmem_cap * 0.8), 104 << 20))
    if tm is None:
        tm = _pick_tm(NC, HW, vmem_limit)
    grid = pl.cdiv(NC, tm)        # ragged last block -> Pallas masked reads/writes (no x pad)

    # pad ONLY the tiny affine table so in-kernel slices never run past it
    rows_gb = grid * tm
    if rows_gb != NC:
        gb = jnp.pad(gb, ((0, rows_gb - NC), (0, 0)))

    # keep the affine table fully VMEM-resident (single DMA) unless it is large
    gb_resident = rows_gb <= 4096
    if gb_resident:
        gb_spec = pl.BlockSpec((rows_gb, 2), lambda i: (0, 0))   # loaded once, stays resident
    else:
        gb_spec = pl.BlockSpec((tm, 2), lambda i: (i, 0))        # one packed DMA per step

    out = pl.pallas_call(
        functools.partial(adain_kernel, gb_resident=gb_resident),
        out_shape=jax.ShapeDtypeStruct((NC, HW), x.dtype),
        grid_spec=pltpu.PrefetchScalarGridSpec(
            num_scalar_prefetch=0,
            grid=(grid,),
            in_specs=[
                gb_spec,                                         # [1+gamma, beta]
                pl.BlockSpec((tm, HW), lambda i: (i, 0)),        # x rows
            ],
            out_specs=pl.BlockSpec((tm, HW), lambda i: (i, 0)),
        ),
        compiler_params=pltpu.CompilerParams(
            dimension_semantics=("parallel",),
            vmem_limit_bytes=vmem_limit,
        ),
    )(gb, x_flat)

    return out.reshape(N, C, H, W)


# ---------------- deterministic parameter setup (plain-JAX glue) ------------

def make_spectral_norm_weight(key, out_features, in_features, n_power_iter=10):
    """nn.Linear-style init followed by spectral normalization (power iteration)."""
    kw, kb, ku = jax.random.split(key, 3)
    bound = 1.0 / jnp.sqrt(in_features)
    w = jax.random.uniform(kw, (out_features, in_features),
                           minval=-bound, maxval=bound, dtype=jnp.float32)
    b = jax.random.uniform(kb, (out_features,),
                           minval=-bound, maxval=bound, dtype=jnp.float32)

    u = jax.random.normal(ku, (out_features,), dtype=jnp.float32)
    u = u / (jnp.linalg.norm(u) + 1e-12)
    for _ in range(n_power_iter):
        v = w.T @ u
        v = v / (jnp.linalg.norm(v) + 1e-12)
        u = w @ v
        u = u / (jnp.linalg.norm(u) + 1e-12)
    sigma = u @ (w @ v)
    return w / sigma, b


def adain_reference(x, s, w_sn, b):
    h = s @ w_sn.T + b                                   # (N, 2C)
    N, C = x.shape[0], x.shape[1]
    gamma = h[:, :C].reshape(N, C, 1, 1)
    beta = h[:, C:].reshape(N, C, 1, 1)
    mean = jnp.mean(x, axis=(2, 3), keepdims=True)
    var = jnp.mean((x - mean) ** 2, axis=(2, 3), keepdims=True)
    xn = (x - mean) / jnp.sqrt(var + EPS)
    return (1 + gamma) * xn + beta


if __name__ == "__main__":
    key = jax.random.PRNGKey(0)
    k_x, k_s, k_p, k_x2, k_s2, k_p2 = jax.random.split(key, 6)

    # primary demo shape (grid = 1)
    N, C, H, W = 2, 4, 16, 16
    STYLE_DIM = 8
    x = jax.random.normal(k_x, (N, C, H, W), dtype=jnp.float32)
    s = jax.random.normal(k_s, (N, STYLE_DIM), dtype=jnp.float32)
    w_sn, b = make_spectral_norm_weight(k_p, 2 * C, STYLE_DIM)

    out = jax.block_until_ready(adain_pallas(x, s, w_sn, b))
    ref = adain_reference(x, s, w_sn, b)
    assert out.shape == (N, C, H, W)
    assert jnp.allclose(out, ref, atol=1e-4, rtol=1e-4), "mismatch vs reference"

    # second small shape exercising a multi-step grid (NC = 32 -> 2 grid steps)
    N2, C2 = 4, 8
    x2 = jax.random.normal(k_x2, (N2, C2, H, W), dtype=jnp.float32)
    s2 = jax.random.normal(k_s2, (N2, STYLE_DIM), dtype=jnp.float32)
    w_sn2, b2 = make_spectral_norm_weight(k_p2, 2 * C2, STYLE_DIM)

    out2 = jax.block_until_ready(adain_pallas(x2, s2, w_sn2, b2))
    ref2 = adain_reference(x2, s2, w_sn2, b2)
    assert jnp.allclose(out2, ref2, atol=1e-4, rtol=1e-4), "mismatch vs reference (multi-step)"

    print("KERNEL_OK")
</pallas_src>

<mosaic_0001>
module attributes {stable_mosaic.version = 11 : i64} {
  func.func @adain_kernel(%arg0: i32, %arg1: memref<8x2xf32, #tpu.memory_space<vmem>>, %arg2: memref<8x256xf32, #tpu.memory_space<vmem>>, %arg3: memref<8x256xf32, #tpu.memory_space<vmem>>) attributes {dimension_semantics = [#tpu.dimension_semantics<parallel>], iteration_bounds = array<i64: 1>, scalar_prefetch = 0 : i64, scratch_operands = 0 : i64, tpu.core_type = #tpu.core_type<tc>, window_params = [{pipeline_mode = #tpu.pipeline_mode<synchronous>, transform_indices = @transform_0, window_bounds = array<i64: 8, 2>}, {transform_indices = @transform_1, window_bounds = array<i64: 8, 256>}, {transform_indices = @transform_2, window_bounds = array<i64: 8, 256>}]} {
    %c8_i32 = arith.constant 8 : i32
    %0 = arith.muli %arg0, %c8_i32 : i32
    %1 = tpu.assume_multiple %0, 8 : i32
    %2 = arith.index_cast %1 : i32 to index
    %c0 = arith.constant 0 : index
    %3 = vector.load %arg1[%2, %c0] : memref<8x2xf32, #tpu.memory_space<vmem>>, vector<8x2xf32>
    %4 = vector.extract_strided_slice %3 {offsets = [0, 0], sizes = [8, 1], strides = [1, 1]} : vector<8x2xf32> to vector<8x1xf32>
    %5 = vector.extract_strided_slice %3 {offsets = [0, 1], sizes = [8, 1], strides = [1, 1]} : vector<8x2xf32> to vector<8x1xf32>
    %c0_0 = arith.constant 0 : index
    %c0_1 = arith.constant 0 : index
    %6 = vector.load %arg2[%c0_0, %c0_1] : memref<8x256xf32, #tpu.memory_space<vmem>>, vector<8x256xf32>
    %cst = arith.constant dense<0.000000e+00> : vector<8xf32>
    %7 = vector.multi_reduction <add>, %6, %cst [1] : vector<8x256xf32> to vector<8xf32>
    %8 = vector.shape_cast %7 : vector<8xf32> to vector<8x1xf32>
    %cst_2 = arith.constant 3.906250e-03 : f32
    %9 = vector.broadcast %cst_2 : f32 to vector<8x1xf32>
    %10 = arith.mulf %8, %9 : vector<8x1xf32>
    %11 = vector.broadcast %10 : vector<8x1xf32> to vector<8x256xf32>
    %12 = arith.subf %6, %11 : vector<8x256xf32>
    %13 = arith.mulf %12, %12 : vector<8x256xf32>
    %cst_3 = arith.constant dense<0.000000e+00> : vector<8xf32>
    %14 = vector.multi_reduction <add>, %13, %cst_3 [1] : vector<8x256xf32> to vector<8xf32>
    %15 = vector.shape_cast %14 : vector<8xf32> to vector<8x1xf32>
    %cst_4 = arith.constant 3.906250e-03 : f32
    %16 = vector.broadcast %cst_4 : f32 to vector<8x1xf32>
    %17 = arith.mulf %15, %16 : vector<8x1xf32>
    %cst_5 = arith.constant 9.99999974E-6 : f32
    %18 = vector.broadcast %cst_5 : f32 to vector<8x1xf32>
    %19 = arith.addf %17, %18 : vector<8x1xf32>
    %20 = math.rsqrt %19 : vector<8x1xf32>
    %21 = arith.mulf %4, %20 : vector<8x1xf32>
    %22 = vector.broadcast %21 : vector<8x1xf32> to vector<8x256xf32>
    %23 = arith.mulf %12, %22 : vector<8x256xf32>
    %24 = vector.broadcast %5 : vector<8x1xf32> to vector<8x256xf32>
    %25 = arith.addf %23, %24 : vector<8x256xf32>
    %c0_6 = arith.constant 0 : index
    %c0_7 = arith.constant 0 : index
    %26 = vector.load %arg3[%c0_6, %c0_7] : memref<8x256xf32, #tpu.memory_space<vmem>>, vector<8x256xf32>
    tpu.vector_store %arg3[%c0_6, %c0_7], %25 {strides = array<i32>} : memref<8x256xf32, #tpu.memory_space<vmem>>, vector<8x256xf32>,
    return
  }
  func.func @transform_0(%arg0: i32) -> (i32, i32) {
    %c0_i32 = arith.constant 0 : i32
    %c0_i32_0 = arith.constant 0 : i32
    %c0_i32_1 = arith.constant 0 : i32
    return %c0_i32, %c0_i32_0 : i32, i32
  }
  func.func @transform_1(%arg0: i32) -> (i32, i32) {
    %c0_i32 = arith.constant 0 : i32
    %c0_i32_0 = arith.constant 0 : i32
    return %arg0, %c0_i32 : i32, i32
  }
  func.func @transform_2(%arg0: i32) -> (i32, i32) {
    %c0_i32 = arith.constant 0 : i32
    %c0_i32_0 = arith.constant 0 : i32
    return %arg0, %c0_i32 : i32, i32
  }
}

</mosaic_0001>

<bundles_post_ra>
// kernel: tpu_custom_call.1
= control target key start
LH: loop header
LB: loop body
LE: loop exit
PB: predicated region body
PF: predicated region fallthrough
CT: control target
= control target key end

     0   :  { %7 = vsyncpa [#allocation3], 0  ;;  %s156_s0 = inlined_call_operand.vmem [shape: f32[8,2], index: 0, kind: input, shape index: {}]   ;;  %s157_s1 = inlined_call_operand.hbm [shape: f32[8,256], index: 1, kind: input, shape index: {}]   ;;  %s158_s2 = inlined_call_operand.hbm [shape: f32[8,256], index: 2, kind: output, shape index: {}]  }
   0x1   :  { %8 = vsyncpa [#allocation4], 0  ;;  %s128_s9 = smov [#allocation2]  }
   0x2   :  { %s17_s10 = sshll.u32 %s128_s9, 4  ;;  %s18_s10 = int_to_ptr.vmem [resolvable:$true] %s17_s10 }
   0x3   :  { %s92_s11 = scalar_lea.vmem %s18_s10, 256  ;;  %p97_p1 = scmp.lt.s32.totalorder %s18_s10, %s18_s10 }
   0x4   :  { %p93_p0 = scmp.ne.s32.totalorder %s18_s10, %s92_s11  ;;  %p98_p2 = scmp.lt.s32.totalorder %s92_s11, %s92_s11 }
   0x6   :  { %p99_p3 = por %p98_p2, %p97_p1 }
   0x8   :  { %p100_p4 = pnand %p99_p3, %p93_p0 }
   0xa   :  { %103 = shalt.err (!%p100_p4)
}
   0xb   :  { %20 = dma.hbm_to_vmem [thread:$0]  %s157_s1, 256, %s18_s10, [#allocation3]  }
   0xc   :  { %124 = dma.done.wait [#allocation3], 256  }
   0xd   :  { %125 = vsyncadd [#allocation3], 4294967040  ;;  %v27_v0 = vld [vmem:[#allocation2] sm:$0xff]  ;;  %v28_v1 = vld [vmem:[#allocation2 + $0x8] sm:$0xff]  ;;  %v129_v10 = vmov 0   ;;  %v130_v11 = vmov 1  }
   0xe   :  { %v29_v2 = vadd.f32 %v28_v1, %v27_v0  ;;  %79 = vset.pattern.permute.xlu1 %v129_v10  ;;  %81 = vset.pattern.permute.xlu0 %v130_v11  ;;  %v26_v15 = vld [vmem:[%s156_s0] sm:$0xff]  ;;  %s131_s15 = smov [#allocation5]  }
   0xf   :  { %s66_s16 = sshll.u32 %s131_s15, 4  ;;  %s67_s16 = int_to_ptr.vmem [resolvable:$true] %s66_s16 }
  0x10   :  { %30 = vadd.xlane.f32.xlu0 %v29_v2  ;;  %s104_s17 = scalar_lea.vmem %s67_s16, 256  ;;  %p109_p6 = scmp.lt.s32.totalorder %s67_s16, %s67_s16 }
  0x11   :  { %p105_p5 = scmp.ne.s32.totalorder %s67_s16, %s104_s17  ;;  %p110_p7 = scmp.lt.s32.totalorder %s104_s17, %s104_s17 }
  0x13   :  { %p111_p8 = por %p110_p7, %p109_p6 }
  0x15   :  { %p112_p9 = pnand %p111_p8, %p105_p5 }
  0x99   :  { %v31_v3 = vpop.xlane.xlu0 %30 }
  0x9a   :  { %v32_v4 = vmul.f32 0.00390625, %v31_v3 }
  0x9c   :  { %v33_v5 = vsub.f32 %v27_v0, %v32_v4  ;;  %v34_v6 = vsub.f32 %v28_v1, %v32_v4 }
  0x9e   :  { %v35_v7 = vmul.f32 %v33_v5, %v33_v5  ;;  %v36_v8 = vmul.f32 %v34_v6, %v34_v6 }
  0xa0   :  { %v37_v9 = vadd.f32 %v36_v8, %v35_v7 }
  0xa2   :  { %38 = vadd.xlane.f32.xlu0 %v37_v9 }
 0x12b   :  { %v39_v12 = vpop.xlane.xlu0 %38 }
 0x12c   :  { %v40_v13 = vmul.f32 0.00390625, %v39_v12 }
 0x12e   :  { %v41_v14 = vadd.f32 1e-05, %v40_v13 }
 0x130   :  { %82 = vrsqrt.f32 %v41_v14 }
 0x13d   :  { %v83_v16 = vpop.eup %82 }
 0x13e   :  { %v43_v17 = vmul.f32 %v83_v16, %v26_v15 }
 0x140   :  { %46 = vperm.xlu1 %79, %v43_v17  }
 0x144   :  { %80 = vset.pattern.permute.xlu1 %v130_v11 }
 0x145   :  { %53 = vperm.xlu1 %80, %v26_v15  }
 0x1bb   :  { %v47_v18 = vpop.permute.xlu1 %46 }
 0x1bc   :  { %v49_v19 = vmul.f32 %v47_v18, %v33_v5  ;;  %v50_v20 = vmul.f32 %v47_v18, %v34_v6 }
 0x1c0   :  { %v54_v21 = vpop.permute.xlu1 %53 }
 0x1c1   :  { %v56_v22 = vadd.f32 %v54_v21, %v49_v19  ;;  %v57_v23 = vadd.f32 %v54_v21, %v50_v20 }
 0x1c3   :  { %58 = vst [vmem:[#allocation5] sm:$0xff] %v56_v22  ;;  %59 = vst [vmem:[#allocation5 + $0x8] sm:$0xff] %v57_v23 }
 0x1c4   :  { %115 = shalt.err (!%p112_p9)
}
 0x1c5   :  { %69 = dma.vmem_to_hbm [thread:$0]  %s67_s16, 256, %s158_s2, [#allocation4]  }
 0x1c6   :  { %126 = dma.done.wait [#allocation4], 256  }
 0x1c7   :  { %127 = vsyncadd [#allocation4], 4294967040 }
 0x1c8   :  { %73 = vsyncpa [#allocation3], 1 }
 0x1c9   :  { %74 = vsyncpa [#allocation4], 1 }

</bundles_post_ra>
